<compile_context>
chip_gen: v7x
topology: tpu7x:2x2x1
jax: 0.10.0
libtpu: 0.0.40
codegen_flags: <defaults>
</compile_context>

<pallas_src>
import math

import jax
import jax.numpy as jnp
from jax import lax
from jax.experimental import pallas as pl
from jax.experimental.pallas import tpu as pltpu

# ---- sizes -----------------------------------------------------------------
B, S = 2, 8          # batch, sequence length
D_IN, D = 4, 32      # dims[0], dims[-1]
H = 4                # attention heads
DH = D // H          # head dim
FF = 64              # feed-forward hidden dim
EPS = 1e-5
N = B * S            # collapsed (batch * seq) rows handled in one invocation
NEG = -1e30          # additive mask value for cross-batch attention entries

# ---- parameter-slab row layout (all offsets are multiples of 8) -------------
R_WXQ   = 0            # (D_IN, D)   scaled, mapping-folded Q weight
R_WMAP  = 8            # (D_IN, D)   mapping weight (residual path only)
R_BQ    = 16           # (N, D)      per-row Q bias (PE + bmap folded, scaled)
R_WXKVT = 32           # (2D, D_IN)  mapping-folded K/V weights, transposed
R_BKVT  = 96           # (2D, N)     per-row K/V biases, transposed
R_WO    = 160          # (D, D)      output projection
R_W1    = 192          # (D, FF)     FFN up
R_W2    = 224          # (FF, D)     FFN down
R_MASK  = 288          # (N, N)      block-diagonal batch mask (0 / NEG)
R_VEC   = 304          # (8, 128)    bmap, bo, ln1g, ln1b, b1, b2, ln2g, ln2b
R_TOTAL = 312


def _layernorm(z, g, b):
    mu = jnp.mean(z, axis=-1, keepdims=True)
    var = jnp.mean((z - mu) * (z - mu), axis=-1, keepdims=True)
    return (z - mu) * lax.rsqrt(var + EPS) * g + b


def tencoder_kernel(x_ref, slab_ref, o_ref):
    # TODO(synk): nn.Dropout(p=0.5) is identity in eval mode; training-mode
    # stochastic masking is not implemented.

    x = x_ref[...]                                           # (N, D_IN)

    # ---- small-vector slab row (one vreg): biases + LayerNorm params --------
    vec  = slab_ref[R_VEC:R_VEC + 8, :]                      # (8, 128)
    bmap = vec[0:1, 0:D]
    bo   = vec[1:2, 0:D]
    ln1g = vec[2:3, 0:D]
    ln1b = vec[3:4, 0:D]
    b1   = vec[4:5, 0:FF]
    b2   = vec[5:6, 0:D]
    ln2g = vec[6:7, 0:D]
    ln2b = vec[7:8, 0:D]

    # ---- Q projection straight from x (Wmap, PE, bias, 1/sqrt(DH) folded) ---
    q = (jnp.dot(x, slab_ref[R_WXQ:R_WXQ + D_IN, 0:D],
                 preferred_element_type=jnp.float32)
         + slab_ref[R_BQ:R_BQ + N, 0:D])                     # (N, D), pre-scaled

    # ---- K/V projection, produced transposed (2D, N) ------------------------
    # kvT[r, i] = sum_d Wxkv^T[r, d] * x[i, d]   (contract-(1,1) == A @ B^T)
    kvT = (lax.dot_general(slab_ref[R_WXKVT:R_WXKVT + 2 * D, 0:D_IN], x,
                           (((1,), (1,)), ((), ())),
                           preferred_element_type=jnp.float32)
           + slab_ref[R_BKVT:R_BKVT + 2 * D, 0:N])           # (2D, N)
    kT = kvT[0:D, :]                                         # (D, N) sublane view
    vT = kvT[D:2 * D, :]                                     # (D, N) sublane view

    # ---- residual-path mapping y = x @ Wmap + bmap (off the critical path) --
    y = (jnp.dot(x, slab_ref[R_WMAP:R_WMAP + D_IN, 0:D],
                 preferred_element_type=jnp.float32) + bmap) # (N, D)

    # ---- multi-head attention, heads accumulated straight through Wo --------
    neg = slab_ref[R_MASK:R_MASK + N, 0:N]                   # (N, N) static mask
    attn = jnp.zeros((N, D), jnp.float32)
    for h in range(H):                                       # static unroll
        # only remaining lane sub-slice (Q natural layout); K/V/Wo slices are
        # sublane-aligned free views.
        qh  = q[:, h * DH:(h + 1) * DH]                      # (N, DH)
        khT = kT[h * DH:(h + 1) * DH, :]                     # (DH, N)
        vhT = vT[h * DH:(h + 1) * DH, :]                     # (DH, N)

        s = jnp.dot(qh, khT, preferred_element_type=jnp.float32) + neg  # (N, N)
        s = s - jnp.max(s, axis=-1, keepdims=True)
        p = jnp.exp(s)
        p = p * pl.reciprocal(jnp.sum(p, axis=-1, keepdims=True), approx=True)

        oh = lax.dot_general(p, vhT, (((1,), (1,)), ((), ())),
                             preferred_element_type=jnp.float32)        # (N, DH)
        wo_h = slab_ref[R_WO + h * DH:R_WO + (h + 1) * DH, 0:D]         # (DH, D)
        attn = attn + jnp.dot(oh, wo_h, preferred_element_type=jnp.float32)
    attn = attn + bo

    # ---- residual + LayerNorm (post-norm) ------------------------------------
    z = _layernorm(y + attn, ln1g, ln1b)

    # ---- feed-forward network -------------------------------------------------
    hdn = jnp.maximum(
        jnp.dot(z, slab_ref[R_W1:R_W1 + D, 0:FF],
                preferred_element_type=jnp.float32) + b1, 0.0)
    ffn = jnp.dot(hdn, slab_ref[R_W2:R_W2 + FF, 0:D],
                  preferred_element_type=jnp.float32) + b2

    o_ref[...] = _layernorm(z + ffn, ln2g, ln2b).astype(o_ref.dtype)


def sinusoidal_pe(seq_len, dims):
    pos = jnp.arange(seq_len, dtype=jnp.float32)[:, None]
    i = jnp.arange(0, dims, 2, dtype=jnp.float32)[None, :]
    div = jnp.exp(-i * (math.log(10000.0) / dims))
    pe = jnp.zeros((seq_len, dims), jnp.float32)
    pe = pe.at[:, 0::2].set(jnp.sin(pos * div))
    pe = pe.at[:, 1::2].set(jnp.cos(pos * div))
    return pe


def fuse_params(params):
    """One-time host-side fusion of everything into a single (312,128) slab."""
    (wmap, bmap, wq, bq, wk, bk, wv, bv, wo, bo,
     ln1g, ln1b, w1, b1, w2, b2, ln2g, ln2b) = params

    pe = sinusoidal_pe(S, D)                                  # static, off hot path
    pe_rows = jnp.tile(pe, (B, 1))                            # (N, D), row i = (b, s)
    scale = 1.0 / math.sqrt(DH)

    # Q path: mapping weight, PE, bias and 1/sqrt(DH) folded in.
    wxq = (wmap @ wq) * scale                                 # (D_IN, D)
    bq_eff = ((pe_rows + bmap) @ wq + bq) * scale             # (N, D)

    # K / V paths, stored transposed so per-head extraction is sublane-aligned.
    wxkT = (wmap @ wk).T                                      # (D, D_IN)
    wxvT = (wmap @ wv).T                                      # (D, D_IN)
    bk_effT = ((pe_rows + bmap) @ wk + bk).T                  # (D, N)
    bv_effT = jnp.broadcast_to(bmap @ wv + bv, (N, D)).T      # (D, N), no PE on V
    wxkvT = jnp.concatenate([wxkT, wxvT], axis=0)             # (2D, D_IN)
    bkvT = jnp.concatenate([bk_effT, bv_effT], axis=0)        # (2D, N)

    # Static block-diagonal batch mask (rows of different batches don't attend).
    rb = jnp.arange(N)[:, None] // S
    cb = jnp.arange(N)[None, :] // S
    neg = jnp.where(rb == cb, 0.0, NEG).astype(jnp.float32)   # (N, N)

    slab = jnp.zeros((R_TOTAL, 128), jnp.float32)
    slab = slab.at[R_WXQ:R_WXQ + D_IN, 0:D].set(wxq)
    slab = slab.at[R_WMAP:R_WMAP + D_IN, 0:D].set(wmap)
    slab = slab.at[R_BQ:R_BQ + N, 0:D].set(bq_eff)
    slab = slab.at[R_WXKVT:R_WXKVT + 2 * D, 0:D_IN].set(wxkvT)
    slab = slab.at[R_BKVT:R_BKVT + 2 * D, 0:N].set(bkvT)
    slab = slab.at[R_WO:R_WO + D, 0:D].set(wo)
    slab = slab.at[R_W1:R_W1 + D, 0:FF].set(w1)
    slab = slab.at[R_W2:R_W2 + FF, 0:D].set(w2)
    slab = slab.at[R_MASK:R_MASK + N, 0:N].set(neg)
    slab = slab.at[R_VEC + 0, 0:D].set(bmap[0])
    slab = slab.at[R_VEC + 1, 0:D].set(bo[0])
    slab = slab.at[R_VEC + 2, 0:D].set(ln1g[0])
    slab = slab.at[R_VEC + 3, 0:D].set(ln1b[0])
    slab = slab.at[R_VEC + 4, 0:FF].set(b1[0])
    slab = slab.at[R_VEC + 5, 0:D].set(b2[0])
    slab = slab.at[R_VEC + 6, 0:D].set(ln2g[0])
    slab = slab.at[R_VEC + 7, 0:D].set(ln2b[0])
    return slab


def tencoder_forward(x, slab):
    x2d = x.reshape(N, D_IN)                                  # collapse batch into rows
    out = pl.pallas_call(
        tencoder_kernel,
        out_shape=jax.ShapeDtypeStruct((N, D), jnp.float32),
        # Grid-less single invocation: whole arrays resident in VMEM, no
        # pipelining / double-buffering bookkeeping (2 input DMAs total).
        in_specs=[
            pl.BlockSpec(memory_space=pltpu.MemorySpace.VMEM),   # x (flattened)
            pl.BlockSpec(memory_space=pltpu.MemorySpace.VMEM),   # packed param slab
        ],
        out_specs=pl.BlockSpec(memory_space=pltpu.MemorySpace.VMEM),
    )(x2d, slab)
    return out.reshape(B, S, D)


def make_params(key):
    ks = jax.random.split(key, 14)

    def lin(kw, kb, fan_in, fan_out):
        # PyTorch Linear stores W as (out, in); we pre-transpose to (in, out).
        bound = 1.0 / math.sqrt(fan_in)
        w = jax.random.uniform(kw, (fan_in, fan_out), jnp.float32, -bound, bound)
        b = jax.random.uniform(kb, (1, fan_out), jnp.float32, -bound, bound)
        return w, b

    wmap, bmap = lin(ks[0], ks[1], D_IN, D)
    wq, bq = lin(ks[2], ks[3], D, D)
    wk, bk = lin(ks[4], ks[5], D, D)
    wv, bv = lin(ks[6], ks[7], D, D)
    wo, bo = lin(ks[8], ks[9], D, D)
    w1, b1 = lin(ks[10], ks[11], D, FF)
    w2, b2 = lin(ks[12], ks[13], FF, D)
    ln1g = jnp.ones((1, D), jnp.float32); ln1b = jnp.zeros((1, D), jnp.float32)
    ln2g = jnp.ones((1, D), jnp.float32); ln2b = jnp.zeros((1, D), jnp.float32)
    return (wmap, bmap, wq, bq, wk, bk, wv, bv, wo, bo,
            ln1g, ln1b, w1, b1, w2, b2, ln2g, ln2b)


def reference_forward(x, params):
    (wmap, bmap, wq, bq, wk, bk, wv, bv, wo, bo,
     ln1g, ln1b, w1, b1, w2, b2, ln2g, ln2b) = params
    pe = sinusoidal_pe(S, D)

    def ln(z, g, b):
        mu = z.mean(-1, keepdims=True)
        var = ((z - mu) ** 2).mean(-1, keepdims=True)
        return (z - mu) / jnp.sqrt(var + EPS) * g + b

    y = x @ wmap + bmap
    qk = y + pe
    Q, K, V = qk @ wq + bq, qk @ wk + bk, y @ wv + bv
    Qh = Q.reshape(B, S, H, DH).transpose(0, 2, 1, 3)
    Kh = K.reshape(B, S, H, DH).transpose(0, 2, 1, 3)
    Vh = V.reshape(B, S, H, DH).transpose(0, 2, 1, 3)
    s = jnp.einsum("bhqd,bhkd->bhqk", Qh, Kh) / math.sqrt(DH)
    p = jax.nn.softmax(s, axis=-1)
    a = jnp.einsum("bhqk,bhkd->bhqd", p, Vh).transpose(0, 2, 1, 3).reshape(B, S, D)
    a = a @ wo + bo
    z = ln(y + a, ln1g, ln1b)
    ffn = jnp.maximum(z @ w1 + b1, 0.0) @ w2 + b2
    return ln(z + ffn, ln2g, ln2b)


if __name__ == "__main__":
    key = jax.random.PRNGKey(0)
    kx, kp = jax.random.split(key)
    x = jax.random.normal(kx, (B, S, D_IN), jnp.float32)
    params = make_params(kp)
    slab = fuse_params(params)           # one-time host-side fusion into one slab

    out = tencoder_forward(x, slab)
    out = jax.block_until_ready(out)

    ref = reference_forward(x, params)
    assert out.shape == (B, S, D)
    # tolerance 2e-3 because of pl.reciprocal(approx=True) in the softmax and
    # fp-association changes from folding Wmap into the QKV projections.
    assert jnp.allclose(out, ref, atol=2e-3, rtol=2e-3), "mismatch vs JAX reference"
    print("KERNEL_OK")
</pallas_src>

<mosaic_0001>
module attributes {stable_mosaic.version = 11 : i64} {
  func.func @tencoder_kernel(%arg0: memref<16x4xf32, #tpu.memory_space<vmem>>, %arg1: memref<312x128xf32, #tpu.memory_space<vmem>>, %arg2: memref<16x32xf32, #tpu.memory_space<vmem>>) attributes {dimension_semantics = [], scalar_prefetch = 0 : i64, scratch_operands = 0 : i64, tpu.core_type = #tpu.core_type<tc>} {
    %c0 = arith.constant 0 : index
    %c0_0 = arith.constant 0 : index
    %0 = vector.load %arg0[%c0, %c0_0] : memref<16x4xf32, #tpu.memory_space<vmem>>, vector<16x4xf32>
    %c304 = arith.constant 304 : index
    %c0_1 = arith.constant 0 : index
    %1 = vector.load %arg1[%c304, %c0_1] : memref<312x128xf32, #tpu.memory_space<vmem>>, vector<8x128xf32>
    %2 = vector.extract_strided_slice %1 {offsets = [0, 0], sizes = [1, 32], strides = [1, 1]} : vector<8x128xf32> to vector<1x32xf32>
    %3 = vector.extract_strided_slice %1 {offsets = [1, 0], sizes = [1, 32], strides = [1, 1]} : vector<8x128xf32> to vector<1x32xf32>
    %4 = vector.extract_strided_slice %1 {offsets = [2, 0], sizes = [1, 32], strides = [1, 1]} : vector<8x128xf32> to vector<1x32xf32>
    %5 = vector.extract_strided_slice %1 {offsets = [3, 0], sizes = [1, 32], strides = [1, 1]} : vector<8x128xf32> to vector<1x32xf32>
    %6 = vector.extract_strided_slice %1 {offsets = [4, 0], sizes = [1, 64], strides = [1, 1]} : vector<8x128xf32> to vector<1x64xf32>
    %7 = vector.extract_strided_slice %1 {offsets = [5, 0], sizes = [1, 32], strides = [1, 1]} : vector<8x128xf32> to vector<1x32xf32>
    %8 = vector.extract_strided_slice %1 {offsets = [6, 0], sizes = [1, 32], strides = [1, 1]} : vector<8x128xf32> to vector<1x32xf32>
    %9 = vector.extract_strided_slice %1 {offsets = [7, 0], sizes = [1, 32], strides = [1, 1]} : vector<8x128xf32> to vector<1x32xf32>
    %c0_2 = arith.constant 0 : index
    %c0_3 = arith.constant 0 : index
    %10 = vector.load %arg1[%c0_2, %c0_3] : memref<312x128xf32, #tpu.memory_space<vmem>>, vector<4x32xf32>
    %cst = arith.constant dense<0.000000e+00> : vector<16x32xf32>
    %11 = tpu.matmul %0, %10, %cst {dimension_numbers = #tpu.dot_dimension_numbers<[1], [0], [0], [1], [0, 0, 1, 1], [], []>} : vector<16x4xf32>, vector<4x32xf32>, vector<16x32xf32> -> vector<16x32xf32>
    %c16 = arith.constant 16 : index
    %c0_4 = arith.constant 0 : index
    %12 = vector.load %arg1[%c16, %c0_4] : memref<312x128xf32, #tpu.memory_space<vmem>>, vector<16x32xf32>
    %13 = arith.addf %11, %12 : vector<16x32xf32>
    %c32 = arith.constant 32 : index
    %c0_5 = arith.constant 0 : index
    %14 = vector.load %arg1[%c32, %c0_5] : memref<312x128xf32, #tpu.memory_space<vmem>>, vector<64x4xf32>
    %cst_6 = arith.constant dense<0.000000e+00> : vector<64x16xf32>
    %15 = tpu.matmul %14, %0, %cst_6 {dimension_numbers = #tpu.dot_dimension_numbers<[1], [1], [0], [0], [0, 0, 1, 0], [], []>} : vector<64x4xf32>, vector<16x4xf32>, vector<64x16xf32> -> vector<64x16xf32>
    %c96 = arith.constant 96 : index
    %c0_7 = arith.constant 0 : index
    %16 = vector.load %arg1[%c96, %c0_7] : memref<312x128xf32, #tpu.memory_space<vmem>>, vector<64x16xf32>
    %17 = arith.addf %15, %16 : vector<64x16xf32>
    %18 = vector.extract_strided_slice %17 {offsets = [0, 0], sizes = [32, 16], strides = [1, 1]} : vector<64x16xf32> to vector<32x16xf32>
    %19 = vector.extract_strided_slice %17 {offsets = [32, 0], sizes = [32, 16], strides = [1, 1]} : vector<64x16xf32> to vector<32x16xf32>
    %c8 = arith.constant 8 : index
    %c0_8 = arith.constant 0 : index
    %20 = vector.load %arg1[%c8, %c0_8] : memref<312x128xf32, #tpu.memory_space<vmem>>, vector<4x32xf32>
    %cst_9 = arith.constant dense<0.000000e+00> : vector<16x32xf32>
    %21 = tpu.matmul %0, %20, %cst_9 {dimension_numbers = #tpu.dot_dimension_numbers<[1], [0], [0], [1], [0, 0, 1, 1], [], []>} : vector<16x4xf32>, vector<4x32xf32>, vector<16x32xf32> -> vector<16x32xf32>
    %22 = vector.broadcast %2 : vector<1x32xf32> to vector<16x32xf32>
    %23 = arith.addf %21, %22 : vector<16x32xf32>
    %c288 = arith.constant 288 : index
    %c0_10 = arith.constant 0 : index
    %24 = vector.load %arg1[%c288, %c0_10] : memref<312x128xf32, #tpu.memory_space<vmem>>, vector<16x16xf32>
    %cst_11 = arith.constant 0.000000e+00 : f32
    %25 = vector.broadcast %cst_11 : f32 to vector<16x32xf32>
    %26 = vector.extract_strided_slice %13 {offsets = [0, 0], sizes = [16, 8], strides = [1, 1]} : vector<16x32xf32> to vector<16x8xf32>
    %27 = vector.extract_strided_slice %18 {offsets = [0, 0], sizes = [8, 16], strides = [1, 1]} : vector<32x16xf32> to vector<8x16xf32>
    %28 = vector.extract_strided_slice %19 {offsets = [0, 0], sizes = [8, 16], strides = [1, 1]} : vector<32x16xf32> to vector<8x16xf32>
    %cst_12 = arith.constant dense<0.000000e+00> : vector<16x16xf32>
    %29 = tpu.matmul %26, %27, %cst_12 {dimension_numbers = #tpu.dot_dimension_numbers<[1], [0], [0], [1], [0, 0, 1, 1], [], []>} : vector<16x8xf32>, vector<8x16xf32>, vector<16x16xf32> -> vector<16x16xf32>
    %30 = arith.addf %29, %24 : vector<16x16xf32>
    %cst_13 = arith.constant dense<0xFF800000> : vector<16xf32>
    %31 = vector.multi_reduction <maximumf>, %30, %cst_13 [1] : vector<16x16xf32> to vector<16xf32>
    %32 = vector.shape_cast %31 : vector<16xf32> to vector<16x1xf32>
    %33 = vector.broadcast %32 : vector<16x1xf32> to vector<16x16xf32>
    %34 = arith.subf %30, %33 : vector<16x16xf32>
    %35 = math.exp %34 : vector<16x16xf32>
    %cst_14 = arith.constant dense<0.000000e+00> : vector<16xf32>
    %36 = vector.multi_reduction <add>, %35, %cst_14 [1] : vector<16x16xf32> to vector<16xf32>
    %37 = vector.shape_cast %36 : vector<16xf32> to vector<16x1xf32>
    %38 = tpu.reciprocal %37 {approx = true} : vector<16x1xf32> -> vector<16x1xf32>
    %39 = vector.broadcast %38 : vector<16x1xf32> to vector<16x16xf32>
    %40 = arith.mulf %35, %39 : vector<16x16xf32>
    %cst_15 = arith.constant dense<0.000000e+00> : vector<16x8xf32>
    %41 = tpu.matmul %40, %28, %cst_15 {dimension_numbers = #tpu.dot_dimension_numbers<[1], [1], [0], [0], [0, 0, 1, 0], [], []>} : vector<16x16xf32>, vector<8x16xf32>, vector<16x8xf32> -> vector<16x8xf32>
    %c160 = arith.constant 160 : index
    %c0_16 = arith.constant 0 : index
    %42 = vector.load %arg1[%c160, %c0_16] : memref<312x128xf32, #tpu.memory_space<vmem>>, vector<8x32xf32>
    %cst_17 = arith.constant dense<0.000000e+00> : vector<16x32xf32>
    %43 = tpu.matmul %41, %42, %cst_17 {dimension_numbers = #tpu.dot_dimension_numbers<[1], [0], [0], [1], [0, 0, 1, 1], [], []>} : vector<16x8xf32>, vector<8x32xf32>, vector<16x32xf32> -> vector<16x32xf32>
    %44 = arith.addf %25, %43 : vector<16x32xf32>
    %45 = vector.extract_strided_slice %13 {offsets = [0, 8], sizes = [16, 8], strides = [1, 1]} : vector<16x32xf32> to vector<16x8xf32>
    %46 = vector.extract_strided_slice %18 {offsets = [8, 0], sizes = [8, 16], strides = [1, 1]} : vector<32x16xf32> to vector<8x16xf32>
    %47 = vector.extract_strided_slice %19 {offsets = [8, 0], sizes = [8, 16], strides = [1, 1]} : vector<32x16xf32> to vector<8x16xf32>
    %cst_18 = arith.constant dense<0.000000e+00> : vector<16x16xf32>
    %48 = tpu.matmul %45, %46, %cst_18 {dimension_numbers = #tpu.dot_dimension_numbers<[1], [0], [0], [1], [0, 0, 1, 1], [], []>} : vector<16x8xf32>, vector<8x16xf32>, vector<16x16xf32> -> vector<16x16xf32>
    %49 = arith.addf %48, %24 : vector<16x16xf32>
    %cst_19 = arith.constant dense<0xFF800000> : vector<16xf32>
    %50 = vector.multi_reduction <maximumf>, %49, %cst_19 [1] : vector<16x16xf32> to vector<16xf32>
    %51 = vector.shape_cast %50 : vector<16xf32> to vector<16x1xf32>
    %52 = vector.broadcast %51 : vector<16x1xf32> to vector<16x16xf32>
    %53 = arith.subf %49, %52 : vector<16x16xf32>
    %54 = math.exp %53 : vector<16x16xf32>
    %cst_20 = arith.constant dense<0.000000e+00> : vector<16xf32>
    %55 = vector.multi_reduction <add>, %54, %cst_20 [1] : vector<16x16xf32> to vector<16xf32>
    %56 = vector.shape_cast %55 : vector<16xf32> to vector<16x1xf32>
    %57 = tpu.reciprocal %56 {approx = true} : vector<16x1xf32> -> vector<16x1xf32>
    %58 = vector.broadcast %57 : vector<16x1xf32> to vector<16x16xf32>
    %59 = arith.mulf %54, %58 : vector<16x16xf32>
    %cst_21 = arith.constant dense<0.000000e+00> : vector<16x8xf32>
    %60 = tpu.matmul %59, %47, %cst_21 {dimension_numbers = #tpu.dot_dimension_numbers<[1], [1], [0], [0], [0, 0, 1, 0], [], []>} : vector<16x16xf32>, vector<8x16xf32>, vector<16x8xf32> -> vector<16x8xf32>
    %c168 = arith.constant 168 : index
    %c0_22 = arith.constant 0 : index
    %61 = vector.load %arg1[%c168, %c0_22] : memref<312x128xf32, #tpu.memory_space<vmem>>, vector<8x32xf32>
    %cst_23 = arith.constant dense<0.000000e+00> : vector<16x32xf32>
    %62 = tpu.matmul %60, %61, %cst_23 {dimension_numbers = #tpu.dot_dimension_numbers<[1], [0], [0], [1], [0, 0, 1, 1], [], []>} : vector<16x8xf32>, vector<8x32xf32>, vector<16x32xf32> -> vector<16x32xf32>
    %63 = arith.addf %44, %62 : vector<16x32xf32>
    %64 = vector.extract_strided_slice %13 {offsets = [0, 16], sizes = [16, 8], strides = [1, 1]} : vector<16x32xf32> to vector<16x8xf32>
    %65 = vector.extract_strided_slice %18 {offsets = [16, 0], sizes = [8, 16], strides = [1, 1]} : vector<32x16xf32> to vector<8x16xf32>
    %66 = vector.extract_strided_slice %19 {offsets = [16, 0], sizes = [8, 16], strides = [1, 1]} : vector<32x16xf32> to vector<8x16xf32>
    %cst_24 = arith.constant dense<0.000000e+00> : vector<16x16xf32>
    %67 = tpu.matmul %64, %65, %cst_24 {dimension_numbers = #tpu.dot_dimension_numbers<[1], [0], [0], [1], [0, 0, 1, 1], [], []>} : vector<16x8xf32>, vector<8x16xf32>, vector<16x16xf32> -> vector<16x16xf32>
    %68 = arith.addf %67, %24 : vector<16x16xf32>
    %cst_25 = arith.constant dense<0xFF800000> : vector<16xf32>
    %69 = vector.multi_reduction <maximumf>, %68, %cst_25 [1] : vector<16x16xf32> to vector<16xf32>
    %70 = vector.shape_cast %69 : vector<16xf32> to vector<16x1xf32>
    %71 = vector.broadcast %70 : vector<16x1xf32> to vector<16x16xf32>
    %72 = arith.subf %68, %71 : vector<16x16xf32>
    %73 = math.exp %72 : vector<16x16xf32>
    %cst_26 = arith.constant dense<0.000000e+00> : vector<16xf32>
    %74 = vector.multi_reduction <add>, %73, %cst_26 [1] : vector<16x16xf32> to vector<16xf32>
    %75 = vector.shape_cast %74 : vector<16xf32> to vector<16x1xf32>
    %76 = tpu.reciprocal %75 {approx = true} : vector<16x1xf32> -> vector<16x1xf32>
    %77 = vector.broadcast %76 : vector<16x1xf32> to vector<16x16xf32>
    %78 = arith.mulf %73, %77 : vector<16x16xf32>
    %cst_27 = arith.constant dense<0.000000e+00> : vector<16x8xf32>
    %79 = tpu.matmul %78, %66, %cst_27 {dimension_numbers = #tpu.dot_dimension_numbers<[1], [1], [0], [0], [0, 0, 1, 0], [], []>} : vector<16x16xf32>, vector<8x16xf32>, vector<16x8xf32> -> vector<16x8xf32>
    %c176 = arith.constant 176 : index
    %c0_28 = arith.constant 0 : index
    %80 = vector.load %arg1[%c176, %c0_28] : memref<312x128xf32, #tpu.memory_space<vmem>>, vector<8x32xf32>
    %cst_29 = arith.constant dense<0.000000e+00> : vector<16x32xf32>
    %81 = tpu.matmul %79, %80, %cst_29 {dimension_numbers = #tpu.dot_dimension_numbers<[1], [0], [0], [1], [0, 0, 1, 1], [], []>} : vector<16x8xf32>, vector<8x32xf32>, vector<16x32xf32> -> vector<16x32xf32>
    %82 = arith.addf %63, %81 : vector<16x32xf32>
    %83 = vector.extract_strided_slice %13 {offsets = [0, 24], sizes = [16, 8], strides = [1, 1]} : vector<16x32xf32> to vector<16x8xf32>
    %84 = vector.extract_strided_slice %18 {offsets = [24, 0], sizes = [8, 16], strides = [1, 1]} : vector<32x16xf32> to vector<8x16xf32>
    %85 = vector.extract_strided_slice %19 {offsets = [24, 0], sizes = [8, 16], strides = [1, 1]} : vector<32x16xf32> to vector<8x16xf32>
    %cst_30 = arith.constant dense<0.000000e+00> : vector<16x16xf32>
    %86 = tpu.matmul %83, %84, %cst_30 {dimension_numbers = #tpu.dot_dimension_numbers<[1], [0], [0], [1], [0, 0, 1, 1], [], []>} : vector<16x8xf32>, vector<8x16xf32>, vector<16x16xf32> -> vector<16x16xf32>
    %87 = arith.addf %86, %24 : vector<16x16xf32>
    %cst_31 = arith.constant dense<0xFF800000> : vector<16xf32>
    %88 = vector.multi_reduction <maximumf>, %87, %cst_31 [1] : vector<16x16xf32> to vector<16xf32>
    %89 = vector.shape_cast %88 : vector<16xf32> to vector<16x1xf32>
    %90 = vector.broadcast %89 : vector<16x1xf32> to vector<16x16xf32>
    %91 = arith.subf %87, %90 : vector<16x16xf32>
    %92 = math.exp %91 : vector<16x16xf32>
    %cst_32 = arith.constant dense<0.000000e+00> : vector<16xf32>
    %93 = vector.multi_reduction <add>, %92, %cst_32 [1] : vector<16x16xf32> to vector<16xf32>
    %94 = vector.shape_cast %93 : vector<16xf32> to vector<16x1xf32>
    %95 = tpu.reciprocal %94 {approx = true} : vector<16x1xf32> -> vector<16x1xf32>
    %96 = vector.broadcast %95 : vector<16x1xf32> to vector<16x16xf32>
    %97 = arith.mulf %92, %96 : vector<16x16xf32>
    %cst_33 = arith.constant dense<0.000000e+00> : vector<16x8xf32>
    %98 = tpu.matmul %97, %85, %cst_33 {dimension_numbers = #tpu.dot_dimension_numbers<[1], [1], [0], [0], [0, 0, 1, 0], [], []>} : vector<16x16xf32>, vector<8x16xf32>, vector<16x8xf32> -> vector<16x8xf32>
    %c184 = arith.constant 184 : index
    %c0_34 = arith.constant 0 : index
    %99 = vector.load %arg1[%c184, %c0_34] : memref<312x128xf32, #tpu.memory_space<vmem>>, vector<8x32xf32>
    %cst_35 = arith.constant dense<0.000000e+00> : vector<16x32xf32>
    %100 = tpu.matmul %98, %99, %cst_35 {dimension_numbers = #tpu.dot_dimension_numbers<[1], [0], [0], [1], [0, 0, 1, 1], [], []>} : vector<16x8xf32>, vector<8x32xf32>, vector<16x32xf32> -> vector<16x32xf32>
    %101 = arith.addf %82, %100 : vector<16x32xf32>
    %102 = vector.broadcast %3 : vector<1x32xf32> to vector<16x32xf32>
    %103 = arith.addf %101, %102 : vector<16x32xf32>
    %104 = arith.addf %23, %103 : vector<16x32xf32>
    %cst_36 = arith.constant dense<0.000000e+00> : vector<16xf32>
    %105 = vector.multi_reduction <add>, %104, %cst_36 [1] : vector<16x32xf32> to vector<16xf32>
    %106 = vector.shape_cast %105 : vector<16xf32> to vector<16x1xf32>
    %cst_37 = arith.constant 3.200000e+01 : f32
    %107 = vector.broadcast %cst_37 : f32 to vector<16x1xf32>
    %108 = arith.divf %106, %107 : vector<16x1xf32>
    %109 = vector.broadcast %108 : vector<16x1xf32> to vector<16x32xf32>
    %110 = arith.subf %104, %109 : vector<16x32xf32>
    %111 = vector.broadcast %108 : vector<16x1xf32> to vector<16x32xf32>
    %112 = arith.subf %104, %111 : vector<16x32xf32>
    %113 = arith.mulf %110, %112 : vector<16x32xf32>
    %cst_38 = arith.constant dense<0.000000e+00> : vector<16xf32>
    %114 = vector.multi_reduction <add>, %113, %cst_38 [1] : vector<16x32xf32> to vector<16xf32>
    %115 = vector.shape_cast %114 : vector<16xf32> to vector<16x1xf32>
    %cst_39 = arith.constant 3.200000e+01 : f32
    %116 = vector.broadcast %cst_39 : f32 to vector<16x1xf32>
    %117 = arith.divf %115, %116 : vector<16x1xf32>
    %118 = vector.broadcast %108 : vector<16x1xf32> to vector<16x32xf32>
    %119 = arith.subf %104, %118 : vector<16x32xf32>
    %cst_40 = arith.constant 9.99999974E-6 : f32
    %120 = vector.broadcast %cst_40 : f32 to vector<16x1xf32>
    %121 = arith.addf %117, %120 : vector<16x1xf32>
    %122 = math.rsqrt %121 : vector<16x1xf32>
    %123 = vector.broadcast %122 : vector<16x1xf32> to vector<16x32xf32>
    %124 = arith.mulf %119, %123 : vector<16x32xf32>
    %125 = vector.broadcast %4 : vector<1x32xf32> to vector<16x32xf32>
    %126 = arith.mulf %124, %125 : vector<16x32xf32>
    %127 = vector.broadcast %5 : vector<1x32xf32> to vector<16x32xf32>
    %128 = arith.addf %126, %127 : vector<16x32xf32>
    %c192 = arith.constant 192 : index
    %c0_41 = arith.constant 0 : index
    %129 = vector.load %arg1[%c192, %c0_41] : memref<312x128xf32, #tpu.memory_space<vmem>>, vector<32x64xf32>
    %cst_42 = arith.constant dense<0.000000e+00> : vector<16x64xf32>
    %130 = tpu.matmul %128, %129, %cst_42 {dimension_numbers = #tpu.dot_dimension_numbers<[1], [0], [0], [1], [0, 0, 1, 1], [], []>} : vector<16x32xf32>, vector<32x64xf32>, vector<16x64xf32> -> vector<16x64xf32>
    %131 = vector.broadcast %6 : vector<1x64xf32> to vector<16x64xf32>
    %132 = arith.addf %130, %131 : vector<16x64xf32>
    %cst_43 = arith.constant 0.000000e+00 : f32
    %133 = vector.broadcast %cst_43 : f32 to vector<16x64xf32>
    %134 = arith.maximumf %132, %133 : vector<16x64xf32>
    %c224 = arith.constant 224 : index
    %c0_44 = arith.constant 0 : index
    %135 = vector.load %arg1[%c224, %c0_44] : memref<312x128xf32, #tpu.memory_space<vmem>>, vector<64x32xf32>
    %cst_45 = arith.constant dense<0.000000e+00> : vector<16x32xf32>
    %136 = tpu.matmul %134, %135, %cst_45 {dimension_numbers = #tpu.dot_dimension_numbers<[1], [0], [0], [1], [0, 0, 1, 1], [], []>} : vector<16x64xf32>, vector<64x32xf32>, vector<16x32xf32> -> vector<16x32xf32>
    %137 = vector.broadcast %7 : vector<1x32xf32> to vector<16x32xf32>
    %138 = arith.addf %136, %137 : vector<16x32xf32>
    %139 = arith.addf %128, %138 : vector<16x32xf32>
    %cst_46 = arith.constant dense<0.000000e+00> : vector<16xf32>
    %140 = vector.multi_reduction <add>, %139, %cst_46 [1] : vector<16x32xf32> to vector<16xf32>
    %141 = vector.shape_cast %140 : vector<16xf32> to vector<16x1xf32>
    %cst_47 = arith.constant 3.200000e+01 : f32
    %142 = vector.broadcast %cst_47 : f32 to vector<16x1xf32>
    %143 = arith.divf %141, %142 : vector<16x1xf32>
    %144 = vector.broadcast %143 : vector<16x1xf32> to vector<16x32xf32>
    %145 = arith.subf %139, %144 : vector<16x32xf32>
    %146 = vector.broadcast %143 : vector<16x1xf32> to vector<16x32xf32>
    %147 = arith.subf %139, %146 : vector<16x32xf32>
    %148 = arith.mulf %145, %147 : vector<16x32xf32>
    %cst_48 = arith.constant dense<0.000000e+00> : vector<16xf32>
    %149 = vector.multi_reduction <add>, %148, %cst_48 [1] : vector<16x32xf32> to vector<16xf32>
    %150 = vector.shape_cast %149 : vector<16xf32> to vector<16x1xf32>
    %cst_49 = arith.constant 3.200000e+01 : f32
    %151 = vector.broadcast %cst_49 : f32 to vector<16x1xf32>
    %152 = arith.divf %150, %151 : vector<16x1xf32>
    %153 = vector.broadcast %143 : vector<16x1xf32> to vector<16x32xf32>
    %154 = arith.subf %139, %153 : vector<16x32xf32>
    %cst_50 = arith.constant 9.99999974E-6 : f32
    %155 = vector.broadcast %cst_50 : f32 to vector<16x1xf32>
    %156 = arith.addf %152, %155 : vector<16x1xf32>
    %157 = math.rsqrt %156 : vector<16x1xf32>
    %158 = vector.broadcast %157 : vector<16x1xf32> to vector<16x32xf32>
    %159 = arith.mulf %154, %158 : vector<16x32xf32>
    %160 = vector.broadcast %8 : vector<1x32xf32> to vector<16x32xf32>
    %161 = arith.mulf %159, %160 : vector<16x32xf32>
    %162 = vector.broadcast %9 : vector<1x32xf32> to vector<16x32xf32>
    %163 = arith.addf %161, %162 : vector<16x32xf32>
    %c0_51 = arith.constant 0 : index
    %c0_52 = arith.constant 0 : index
    %164 = vector.load %arg2[%c0_51, %c0_52] : memref<16x32xf32, #tpu.memory_space<vmem>>, vector<16x32xf32>
    tpu.vector_store %arg2[%c0_51, %c0_52], %163 {strides = array<i32>} : memref<16x32xf32, #tpu.memory_space<vmem>>, vector<16x32xf32>,
    return
  }
}

</mosaic_0001>

<bundles_post_ra>
// kernel: tpu_custom_call.1
= control target key start
LH: loop header
LB: loop body
LE: loop exit
PB: predicated region body
PF: predicated region fallthrough
CT: control target
= control target key end

     0   :  { %7 = vsyncpa [#allocation3], 0  ;;  %s2303_s0 = inlined_call_operand.vmem [shape: f32[16,4], index: 0, kind: input, shape index: {}]   ;;  %s2304_s1 = inlined_call_operand.hbm [shape: f32[312,128], index: 1, kind: input, shape index: {}]   ;;  %s2305_s2 = inlined_call_operand.hbm [shape: f32[16,32], index: 2, kind: output, shape index: {}]  }
   0x1   :  { %8 = vsyncpa [#allocation4], 0  ;;  %s2097_s9 = smov [#allocation2]   ;;  %s2049_s13 = scalar_lea.hbm %s2304_s1, 4992 }
   0x2   :  { %s16_s10 = sshll.u32 %s2097_s9, 4  ;;  %p2050_p0 = scmp.ne.s32.totalorder %s2304_s1, %s2049_s13  ;;  %s17_s10 = int_to_ptr.vmem [resolvable:$true] %s16_s10 }
   0x3   :  { %p2053_p1 = scmp.lt.u32.totalorder %s2049_s13, %s2304_s1 }
   0x5   :  { %p2055_p2 = pnand %p2053_p1, %p2050_p0 }
   0x7   :  { %2058 = shalt.err (!%p2055_p2)
}
   0x8   :  { %s2059_s18 = scalar_lea.vmem %s17_s10, 4992  ;;  %p2064_p4 = scmp.lt.s32.totalorder %s17_s10, %s17_s10 }
   0x9   :  { %p2060_p3 = scmp.ne.s32.totalorder %s17_s10, %s2059_s18  ;;  %p2065_p5 = scmp.lt.s32.totalorder %s2059_s18, %s2059_s18 }
   0xb   :  { %p2066_p6 = por %p2065_p5, %p2064_p4 }
   0xd   :  { %p2067_p7 = pnand %p2066_p6, %p2060_p3 }
   0xf   :  { %2070 = shalt.err (!%p2067_p7)
}
  0x10   :  { %s2098_s19 = smov 128   ;;  %s2099_s20 = smov 8  }
  0x11   :  { %22 = dma.hbm_to_vmem [thread:$0]  %s2304_s1, 4992, %s17_s10, [#allocation3], %s2098_s19, %s2098_s19, %s2099_s20  }
  0x12   :  { %2093 = dma.done.wait [#allocation3], 4992  }
  0x13   :  { %2094 = vsyncadd [#allocation3], 4294962304  ;;  %vm39_vm0 = vcmask 1043456   ;;  %vm32_vm1 = vcmask 31744   ;;  %v29_v0 = vld [vmem:[#allocation2] sm:$0xf] }
  0x14   :  { %vm1961_vm2 = vmpackc.low %vm32_vm1, %vm32_vm1  ;;  %v26_v1 = vld [vmem:[%s2303_s0] sm:$0xff]  ;;  %v27_v2 = vld [vmem:[%s2303_s0 + $0x8] sm:$0xff]  ;;  %1844 = vmatprep.subr.msk.mxu1 %vm39_vm0, %v29_v0  ;;  %vm348_vm3 = vcmask 64512   ;;  %s2100_s0 = smov 112   ;;  %vm430_vm4 = vcmask 130048   ;;  %s2101_s1 = smov 120  }
  0x15   :  { %1846 = vmatprep.mubr.msk.f32.mxu1 %vm32_vm1, %v26_v1  ;;  %v1960_v3 = vpack.c.bf16 %v27_v2, %v26_v1  ;;  %v118_v4 = vld [vmem:[#allocation2 + $0x20] sm:$0xff]  ;;  %1845 = vmatpush3.msk.msra.mxu1 %vm39_vm0, %v29_v0  ;;  %v119_v5 = vld [vmem:[#allocation2 + $0x28] sm:$0xff]  ;;  %v120_v6 = vld [vmem:[#allocation2 + $0x30] sm:$0xff]  ;;  %s2102_s27 = smov 104   ;;  %vm1444_vm5 = vcmask 261120   ;;  %vm1587_vm6 = vcmask 523264  }
  0x16   :  { %1867 = vmatprep.mubr.msk.f32.mxu0 %vm32_vm1, %v26_v1  ;;  %1847 = vmatmul.mubr.msk.f32.vlgmr.msra.gmra.mrb[0].mxu1 %vm32_vm1, %v27_v2  ;;  %v121_v7 = vld [vmem:[#allocation2 + $0x38] sm:$0xff]  ;;  %v122_v8 = vld [vmem:[#allocation2 + $0x40] sm:$0xff]  ;;  %v123_v9 = vld [vmem:[#allocation2 + $0x48] sm:$0xff]  ;;  %s2103_s28 = smov [#allocation5]  }
  0x17   :  { %1962 = vmatprep.subr.msk.bf16.mxu1 %vm1961_vm2, %v1960_v3  ;;  %1853 = vmatprep.mubr.msk.f32.mxu1 %vm32_vm1, %v118_v4  ;;  %v124_v10 = vld [vmem:[#allocation2 + $0x50] sm:$0xff]  ;;  %v125_v11 = vld [vmem:[#allocation2 + $0x58] sm:$0xff]  ;;  %v263_v12 = vld [vmem:[#allocation2 + $0x8] sm:$0xf]  ;;  %s1716_s29 = sshll.u32 %s2103_s28, 4  ;;  %s1717_s29 = int_to_ptr.vmem [resolvable:$true] %s1716_s29 }
  0x18   :  { %1865 = vmatprep.subr.msk.mxu0 %vm39_vm0, %v263_v12  ;;  %v30_v13 = vld [vmem:[#allocation2 + $0x10] sm:$0xff]  ;;  %v31_v17 = vld [vmem:[#allocation2 + $0x18] sm:$0xff]  ;;  %v126_v19 = vld [vmem:[#allocation2 + $0x60] sm:$0xff]  ;;  %s2071_s30 = scalar_lea.vmem %s1717_s29, 256  ;;  %p2076_p9 = scmp.lt.s32.totalorder %s1717_s29, %s1717_s29 }
  0x19   :  { %1866 = vmatpush3.msk.msra.mxu0 %vm39_vm0, %v263_v12  ;;  %v128_v23 = vld [vmem:[#allocation2 + $0x70] sm:$0xff]  ;;  %v127_v27 = vld [vmem:[#allocation2 + $0x68] sm:$0xff]  ;;  %v130_v28 = vld [vmem:[#allocation2 + $0x80] sm:$0xff]  ;;  %p2072_p8 = scmp.ne.s32.totalorder %s1717_s29, %s2071_s30  ;;  %p2077_p10 = scmp.lt.s32.totalorder %s2071_s30, %s2071_s30 }
  0x1a   :  { %1868 = vmatmul.mubr.msk.f32.vlgmr.msra.gmra.mrb[0].mxu0 %vm32_vm1, %v27_v2  ;;  %v132_v33 = vld [vmem:[#allocation2 + $0x90] sm:$0xff]  ;;  %v129_v38 = vld [vmem:[#allocation2 + $0x78] sm:$0xff]  ;;  %v2184_v41 = vld [vmem:[#allocation2 + $0x128] sm:$0xff] }
  0x1b   :  { %v2186_v43 = vld [vmem:[#allocation2 + $0x120] sm:$0xff]  ;;  %p2078_p11 = por %p2077_p10, %p2076_p9 }
  0x1c   :  { %1965 = vmatpush3.bf16.xpose.msk.msra.mxu1 %vm1961_vm2, %v1960_v3 }
  0x1d   :  { %p2079_p12 = pnand %p2078_p11, %p2072_p8 }
  0x23   :  { %1854 = vmatmul.mubr.msk.f32.vlgmr.msra.gmra.mrb[2].mxu1 %vm32_vm1, %v119_v5 }
  0x24   :  { %1856 = vmatprep.mubr.msk.f32.mxu1 %vm32_vm1, %v120_v6 }
  0x27   :  { %1857 = vmatmul.mubr.msk.f32.gmra.mrb[4].mxu1 %vm32_vm1, %v121_v7 }
  0x28   :  { %1859 = vmatprep.mubr.msk.f32.mxu1 %vm32_vm1, %v122_v8 }
  0x2b   :  { %1860 = vmatmul.mubr.msk.f32.gmra.mrb[6].mxu1 %vm32_vm1, %v123_v9 }
  0x2c   :  { %1862 = vmatprep.mubr.msk.f32.mxu1 %vm32_vm1, %v124_v10 }
  0x2f   :  { %1863 = vmatmul.mubr.msk.f32.gmra.mrb[8].mxu1 %vm32_vm1, %v125_v11 }
  0xe9   :  { %v1848_v14 = vpop.f32.mrb[0].mxu1 }
  0xea   :  { %v109_v15 = vpop.f32.mrb[1].mxu1  ;;  %v2163_v18 = vadd.f32 %v1848_v14, %v31_v17 }
  0xeb   :  { %v2158_v16 = vadd.f32 %v109_v15, %v30_v13 }
  0xed   :  { %890 = vrot.lane.b32.xlu0 %v2158_v16, %s2100_s0  ;;  %1872 = vmatprep.mubr.msk.f32.mxu0 %vm348_vm3, %v2158_v16 }
  0xf1   :  { %892 = vrot.lane.b32.xlu0 %v2163_v18, %s2100_s0 }
  0xf6   :  { %v1855_v20 = vpop.f32.mrb[2].mxu1 }
  0xf7   :  { %v224_v21 = vpop.f32.mrb[3].mxu1  ;;  %v2170_v31 = vadd.f32 %v1855_v20, %v127_v27 }
  0xf8   :  { %v225_v22 = vadd.f32 %v224_v21, %v126_v19 }
  0xfa   :  { %1870 = vmatprep.subr.mxu0 %v225_v22  ;;  %v1858_v24 = vpop.f32.mrb[4].mxu1 }
  0xfb   :  { %1871 = vmatpush3.msra.mxu0 %v225_v22  ;;  %v234_v25 = vpop.f32.mrb[5].mxu1  ;;  %v2179_v40 = vadd.f32 %v1858_v24, %v129_v38 }
  0xfc   :  { %1873 = vmatmul.mubr.msk.f32.vlgmr.msra.gmra.mrb[2].mxu0 %vm348_vm3, %v2163_v18  ;;  %v235_v26 = vadd.f32 %v234_v25, %v128_v23 }
  0xfe   :  { %v2168_v29 = vpop.f32.mrb[6].mxu1  ;;  %1900 = vmatprep.subr.mxu1 %v235_v26 }
  0xff   :  { %v244_v30 = vpop.f32.mrb[7].mxu1  ;;  %1901 = vmatpush3.msra.mxu1 %v235_v26  ;;  %v133_v26 = vld [vmem:[#allocation2 + $0x98] sm:$0xff] }
 0x100   :  { %v245_v32 = vadd.f32 %v244_v30, %v130_v28 }
 0x102   :  { %1875 = vmatprep.subr.msk.mxu0 %vm430_vm4, %v245_v32  ;;  %v2173_v34 = vpop.f32.mrb[8].mxu1 }
 0x103   :  { %1876 = vmatpush3.xpose.msk.msra.mxu0 %vm430_vm4, %v245_v32  ;;  %v254_v35 = vpop.f32.mrb[9].mxu1 }
 0x104   :  { %1880 = vmatprep.subr.mxu0 %v2170_v31  ;;  %v255_v36 = vadd.f32 %v254_v35, %v132_v33 }
 0x106   :  { %1905 = vmatprep.subr.msk.mxu1 %vm430_vm4, %v255_v36 }
 0x15f   :  { %v891_v37 = vpop.permute.xlu0 %890 }
 0x160   :  { %1902 = vmatprep.mubr.msk.f32.mxu1 %vm348_vm3, %v891_v37 }
 0x163   :  { %v893_v39 = vpop.permute.xlu0 %892 }
 0x164   :  { %1903 = vmatmul.mubr.msk.f32.vlgmr.msra.gmra.mrb[10].mxu1 %vm348_vm3, %v893_v39 }
 0x165   :  { %1906 = vmatpush3.xpose.msk.msra.mxu1 %vm430_vm4, %v255_v36 }
 0x166   :  { %1915 = vmatprep.subr.mxu1 %v2179_v40 }
 0x1cf   :  { %v1874_v42 = vpop.f32.mrb[2].mxu0 }
 0x1d0   :  { %v427_v44 = vadd.f32 %v1874_v42, %v2184_v41  ;;  %v421_v45 = vpop.f32.mrb[3].mxu0 }
 0x1d1   :  { %v422_v46 = vadd.f32 %v421_v45, %v2186_v43 }
 0x1d2   :  { %v434_v47 = vsel %vm430_vm4, %v427_v44, -inf }
 0x1d3   :  { %435 = vmax.xlane.f32.xlu1 %v434_v47  ;;  %v431_v48 = vsel %vm430_vm4, %v422_v46, -inf }
 0x1d7   :  { %432 = vmax.xlane.f32.xlu1 %v431_v48 }
 0x237   :  { %v1904_v49 = vpop.f32.mrb[10].mxu1 }
 0x238   :  { %v970_v50 = vadd.f32 %v1904_v49, %v2184_v41  ;;  %v964_v51 = vpop.f32.mrb[11].mxu1 }
 0x239   :  { %v965_v52 = vadd.f32 %v964_v51, %v2186_v43 }
 0x23a   :  { %v976_v53 = vsel %vm430_vm4, %v970_v50, -inf }
 0x23b   :  { %977 = vmax.xlane.f32.xlu1 %v976_v53  ;;  %v973_v54 = vsel %vm430_vm4, %v965_v52, -inf }
 0x23c   :  { %974 = vmax.xlane.f32.xlu0 %v973_v54 }
 0x24c   :  { %538 = vrot.lane.b32.xlu1 %v2158_v16, %s2101_s1 }
 0x252   :  { %540 = vrot.lane.b32.xlu0 %v2163_v18, %s2101_s1 }
 0x260   :  { %v436_v55 = vpop.xlane.xlu1 %435 }
 0x261   :  { %v438_v56 = vsub.f32 %v427_v44, %v436_v55 }
 0x263   :  { %v441_v57 = vmul.f32 1.442695, %v438_v56 }
 0x264   :  { %v433_v58 = vpop.xlane.xlu1 %432 }
 0x265   :  { %2009 = vpow2.f32 %v441_v57  ;;  %v437_v59 = vsub.f32 %v422_v46, %v433_v58 }
 0x267   :  { %v439_v60 = vmul.f32 1.442695, %v437_v59 }
 0x269   :  { %2011 = vpow2.f32 %v439_v60 }
 0x26f   :  { %v2010_v61 = vpop.eup %2009 }
 0x270   :  { %v446_v62 = vsel %vm430_vm4, %v2010_v61, 0.0 }
 0x271   :  { %447 = vadd.xlane.f32.xlu1 %v446_v62 }
 0x273   :  { %v2012_v63 = vpop.eup %2011 }
 0x274   :  { %v443_v0 = vsel %vm430_vm4, %v2012_v63, 0.0 }
 0x275   :  { %444 = vadd.xlane.f32.xlu1 %v443_v0 }
 0x286   :  { %1163 = vrot.lane.b32.xlu1 %v2158_v16, %s2102_s27  ;;  %v131_v16 = vld [vmem:[#allocation2 + $0x88] sm:$0xff] }
 0x287   :  { %v250_v20 = vadd.f32 %v2168_v29, %v131_v16  ;;  %v260_v29 = vadd.f32 %v2173_v34, %v133_v26  ;;  %v2259_v26 = vld [vmem:[#allocation2 + $0x130] sm:$0xff] }
 0x2c8   :  { %v978_v1 = vpop.xlane.xlu1 %977 }
 0x2c9   :  { %v980_v2 = vsub.f32 %v970_v50, %v978_v1  ;;  %v975_v3 = vpop.xlane.xlu0 %974 }
 0x2ca   :  { %v979_v4 = vsub.f32 %v965_v52, %v975_v3 }
 0x2cb   :  { %v983_v5 = vmul.f32 1.442695, %v980_v2 }
 0x2cc   :  { %v981_v6 = vmul.f32 1.442695, %v979_v4  ;;  %v539_v11 = vpop.permute.xlu1 %538 }
 0x2cd   :  { %2013 = vpow2.f32 %v983_v5 }
 0x2ce   :  { %2015 = vpow2.f32 %v981_v6 }
 0x2d7   :  { %v2014_v7 = vpop.eup %2013 }
 0x2d8   :  { %v988_v8 = vsel %vm430_vm4, %v2014_v7, 0.0  ;;  %v2016_v9 = vpop.eup %2015 }
 0x2d9   :  { %989 = vadd.xlane.f32.xlu1 %v988_v8  ;;  %v985_v10 = vsel %vm430_vm4, %v2016_v9, 0.0 }
 0x2dd   :  { %986 = vadd.xlane.f32.xlu1 %v985_v10  ;;  %v537_v10 = vld [vmem:[#allocation2 + $0xa0] sm:$0xff] }
 0x2ee   :  { %1165 = vrot.lane.b32.xlu1 %v2163_v18, %s2102_s27  ;;  %v541_v18 = vpop.permute.xlu0 %540 }
 0x2fe   :  { %v448_v12 = vpop.xlane.xlu1 %447 }
 0x2ff   :  { %2017 = vrcp.f32 %v448_v12 }
 0x302   :  { %v445_v13 = vpop.xlane.xlu1 %444 }
 0x303   :  { %2019 = vrcp.f32 %v445_v13 }
 0x306   :  { %v1164_v21 = vpop.permute.xlu1 %1163 }
 0x309   :  { %v2018_v14 = vpop.eup %2017 }
 0x30a   :  { %v452_v19 = vmul.f32 %v2018_v14, %v2010_v61 }
 0x30d   :  { %v2020_v15 = vpop.eup %2019 }
 0x30e   :  { %v451_v17 = vmul.f32 %v2020_v15, %v2012_v63 }
 0x310   :  { %1877 = vmatprep.mubr.msk.f32.mxu0 %vm430_vm4, %v451_v17 }
 0x311   :  { %1878 = vmatmul.mubr.msk.f32.vlgmr.msra.gmra.mrb[4].mxu0 %vm430_vm4, %v452_v19 }
 0x312   :  { %1881 = vmatpush3.msra.mxu0 %v2170_v31  ;;  %1882 = vmatprep.mubr.msk.f32.mxu0 %vm348_vm3, %v539_v11 }
 0x313   :  { %1885 = vmatprep.subr.msk.mxu0 %vm430_vm4, %v250_v20 }
 0x315   :  { %1883 = vmatmul.mubr.msk.f32.vlgmr.msra.gmra.mrb[6].mxu0 %vm348_vm3, %v541_v18  ;;  %v1352_v18 = vld [vmem:[#allocation2 + $0xb8] sm:$0xff] }
 0x319   :  { %1886 = vmatpush3.xpose.msk.msra.mxu0 %vm430_vm4, %v250_v20  ;;  %v1079_v20 = vld [vmem:[#allocation2 + $0xb0] sm:$0xff] }
 0x366   :  { %v990_v22 = vpop.xlane.xlu1 %989 }
 0x367   :  { %2021 = vrcp.f32 %v990_v22 }
 0x36a   :  { %v987_v23 = vpop.xlane.xlu1 %986 }
 0x36b   :  { %2023 = vrcp.f32 %v987_v23  ;;  %v264_v23 = vlaneseq }
 0x36e   :  { %v1166_v30 = vpop.permute.xlu1 %1165 }
 0x371   :  { %v2022_v24 = vpop.eup %2021 }
 0x372   :  { %v994_v28 = vmul.f32 %v2022_v24, %v2014_v7  ;;  %v2256_v24 = vshrl.u32 %v264_v23, 7 }
 0x375   :  { %v2024_v25 = vpop.eup %2023 }
 0x376   :  { %v993_v27 = vmul.f32 %v2024_v25, %v2016_v9  ;;  %v727_v9 = vld [vmem:[#allocation2 + $0xa8] sm:$0xff]  ;;  %v266_v25 = vsub.s32 0, %v2256_v24 }
 0x377   :  { %1890 = vmatprep.subr.mxu0 %v727_v9 }
 0x378   :  { %1907 = vmatprep.mubr.msk.f32.mxu1 %vm430_vm4, %v993_v27  ;;  %v1438_v27 = vsub.s32 1, %v2256_v24 }
 0x379   :  { %1908 = vmatmul.mubr.msk.f32.vlgmr.msra.gmra.mrb[12].mxu1 %vm430_vm4, %v994_v28  ;;  %v267_v28 = vrot.slane %v2259_v26, %v266_v25 }
 0x37a   :  { %1916 = vmatpush3.msra.mxu1 %v2179_v40  ;;  %1917 = vmatprep.mubr.msk.f32.mxu1 %vm348_vm3, %v1164_v21 }
 0x37b   :  { %1920 = vmatprep.subr.msk.mxu1 %vm430_vm4, %v260_v29 }
 0x37d   :  { %1918 = vmatmul.mubr.msk.f32.vlgmr.msra.gmra.mrb[14].mxu1 %vm348_vm3, %v1166_v30 }
 0x381   :  { %1921 = vmatpush3.xpose.msk.msra.mxu1 %vm430_vm4, %v260_v29  ;;  %v1439_v29 = vrot.slane %v2259_v26, %v1438_v27 }
 0x3e4   :  { %v2220_v31 = vpop.f32.mrb[4].mxu0 }
 0x3e5   :  { %v2222_v32 = vpop.f32.mrb[5].mxu0 }
 0x3e8   :  { %v1884_v33 = vpop.f32.mrb[6].mxu0 }
 0x3e9   :  { %v618_v34 = vadd.f32 %v1884_v33, %v2184_v41  ;;  %v612_v35 = vpop.f32.mrb[7].mxu0 }
 0x3ea   :  { %v613_v36 = vadd.f32 %v612_v35, %v2186_v43 }
 0x3eb   :  { %v624_v37 = vsel %vm430_vm4, %v618_v34, -inf }
 0x3ec   :  { %625 = vmax.xlane.f32.xlu0 %v624_v37  ;;  %v621_v38 = vsel %vm430_vm4, %v613_v36, -inf }
 0x3ed   :  { %622 = vmax.xlane.f32.xlu1 %v621_v38 }
 0x44c   :  { %v2228_v39 = vpop.f32.mrb[12].mxu1 }
 0x44d   :  { %v2230_v40 = vpop.f32.mrb[13].mxu1 }
 0x450   :  { %v1919_v42 = vpop.f32.mrb[14].mxu1 }
 0x451   :  { %v1243_v44 = vadd.f32 %v1919_v42, %v2184_v41  ;;  %v1237_v45 = vpop.f32.mrb[15].mxu1 }
 0x452   :  { %v1238_v46 = vadd.f32 %v1237_v45, %v2186_v43 }
 0x453   :  { %v1249_v47 = vsel %vm430_vm4, %v1243_v44, -inf }
 0x454   :  { %1250 = vmax.xlane.f32.xlu0 %v1249_v47  ;;  %v1246_v48 = vsel %vm430_vm4, %v1238_v46, -inf }
 0x455   :  { %1247 = vmax.xlane.f32.xlu1 %v1246_v48 }
 0x479   :  { %v626_v49 = vpop.xlane.xlu0 %625 }
 0x47a   :  { %v628_v50 = vsub.f32 %v618_v34, %v626_v49  ;;  %v623_v51 = vpop.xlane.xlu1 %622 }
 0x47b   :  { %v627_v52 = vsub.f32 %v613_v36, %v623_v51  ;;  %v1485_v51 = vld [vmem:[#allocation2 + $0xc8] sm:$0xff] }
 0x47c   :  { %v631_v53 = vmul.f32 1.442695, %v628_v50  ;;  %v1484_v50 = vld [vmem:[#allocation2 + $0xc0] sm:$0xff] }
 0x47d   :  { %v629_v54 = vmul.f32 1.442695, %v627_v52  ;;  %v1966_v52 = vpack.c.bf16 %v1485_v51, %v1484_v50 }
 0x47e   :  { %2025 = vpow2.f32 %v631_v53  ;;  %v1486_v53 = vld [vmem:[#allocation2 + $0xd0] sm:$0xff] }
 0x47f   :  { %2027 = vpow2.f32 %v629_v54  ;;  %v1487_v54 = vld [vmem:[#allocation2 + $0xd8] sm:$0xff]  ;;  %1967 = vmatprep.subr.bf16.mxu1 %v1966_v52 }
 0x488   :  { %v2026_v55 = vpop.eup %2025 }
 0x489   :  { %v2028_v56 = vpop.eup %2027  ;;  %v636_v41 = vsel %vm430_vm4, %v2026_v55, 0.0 }
 0x48a   :  { %637 = vadd.xlane.f32.xlu0 %v636_v41  ;;  %v633_v43 = vsel %vm430_vm4, %v2028_v56, 0.0  ;;  %v1576_v41 = vld [vmem:[#allocation2 + $0xe8] sm:$0xff] }
 0x48b   :  { %634 = vadd.xlane.f32.xlu1 %v633_v43  ;;  %v1577_v43 = vld [vmem:[#allocation2 + $0xf0] sm:$0xff] }
 0x4e1   :  { %v1251_v57 = vpop.xlane.xlu0 %1250 }
 0x4e2   :  { %v1253_v58 = vsub.f32 %v1243_v44, %v1251_v57  ;;  %v1248_v59 = vpop.xlane.xlu1 %1247 }
 0x4e3   :  { %v1252_v60 = vsub.f32 %v1238_v46, %v1248_v59 }
 0x4e4   :  { %v1256_v61 = vmul.f32 1.442695, %v1253_v58  ;;  %v1578_v58 = vld [vmem:[#allocation2 + $0xf8] sm:$0xff] }
 0x4e5   :  { %v1254_v62 = vmul.f32 1.442695, %v1252_v60  ;;  %v1978_v59 = vpack.c.bf16 %v1578_v58, %v1577_v43  ;;  %v1579_v60 = vld [vmem:[#allocation2 + $0x100] sm:$0xff]  ;;  %v1699_v43 = vsub.s32 6, %v2256_v24 }
 0x4e6   :  { %2029 = vpow2.f32 %v1256_v61  ;;  %v1580_v61 = vld [vmem:[#allocation2 + $0x108] sm:$0xff] }
 0x4e7   :  { %2031 = vpow2.f32 %v1254_v62  ;;  %v1982_v62 = vpack.c.bf16 %v1580_v61, %v1579_v60  ;;  %v1700_v58 = vrot.slane %v2259_v26, %v1699_v43 }
 0x4f0   :  { %v2030_v63 = vpop.eup %2029 }
 0x4f1   :  { %v2032_v0 = vpop.eup %2031  ;;  %v1261_v1 = vsel %vm430_vm4, %v2030_v63, 0.0 }
 0x4f2   :  { %1262 = vadd.xlane.f32.xlu0 %v1261_v1  ;;  %v1258_v2 = vsel %vm430_vm4, %v2032_v0, 0.0 }
 0x4f3   :  { %1259 = vadd.xlane.f32.xlu1 %v1258_v2 }
 0x517   :  { %v638_v3 = vpop.xlane.xlu0 %637 }
 0x518   :  { %2033 = vrcp.f32 %v638_v3  ;;  %v635_v4 = vpop.xlane.xlu1 %634 }
 0x519   :  { %2035 = vrcp.f32 %v635_v4 }
 0x522   :  { %v2034_v5 = vpop.eup %2033 }
 0x523   :  { %v2036_v6 = vpop.eup %2035  ;;  %v642_v8 = vmul.f32 %v2034_v5, %v2026_v55  ;;  %v1970_v55 = vpack.c.bf16 %v1487_v54, %v1486_v53  ;;  %v1474_v5 = vsub.s32 2, %v2256_v24 }
 0x524   :  { %v641_v7 = vmul.f32 %v2036_v6, %v2028_v56  ;;  %v1575_v56 = vld [vmem:[#allocation2 + $0xe0] sm:$0xff]  ;;  %v1480_v6 = vsub.s32 3, %v2256_v24 }
 0x525   :  { %v1974_v57 = vpack.c.bf16 %v1576_v41, %v1575_v56 }
 0x526   :  { %1887 = vmatprep.mubr.msk.f32.mxu0 %vm430_vm4, %v641_v7  ;;  %v1475_v7 = vrot.slane %v2259_v26, %v1474_v5 }
 0x527   :  { %1888 = vmatmul.mubr.msk.f32.vlgmr.msra.gmra.mrb[8].mxu0 %vm430_vm4, %v642_v8 }
 0x528   :  { %1891 = vmatpush3.msra.mxu0 %v727_v9 }
 0x529   :  { %1895 = vmatprep.subr.mxu0 %v537_v10 }
 0x57f   :  { %v1263_v11 = vpop.xlane.xlu0 %1262 }
 0x580   :  { %2037 = vrcp.f32 %v1263_v11  ;;  %v1260_v12 = vpop.xlane.xlu1 %1259 }
 0x581   :  { %2039 = vrcp.f32 %v1260_v12  ;;  %v1481_v12 = vrot.slane %v2259_v26, %v1480_v6 }
 0x58a   :  { %v2038_v13 = vpop.eup %2037 }
 0x58b   :  { %v2040_v14 = vpop.eup %2039  ;;  %v1267_v16 = vmul.f32 %v2038_v13, %v2030_v63 }
 0x58c   :  { %v1266_v15 = vmul.f32 %v2040_v14, %v2032_v0 }
 0x58e   :  { %1922 = vmatprep.mubr.msk.f32.mxu1 %vm430_vm4, %v1266_v15 }
 0x58f   :  { %1923 = vmatmul.mubr.msk.f32.vlgmr.msra.gmra.mrb[16].mxu1 %vm430_vm4, %v1267_v16 }
 0x590   :  { %1969 = vmatpush3.bf16.msra.mxu1 %v1966_v52 }
 0x591   :  { %1971 = vmatprep.subr.bf16.mxu1 %v1970_v55 }
 0x594   :  { %1973 = vmatpush3.bf16.msra.mxu1 %v1970_v55 }
 0x5fa   :  { %v1889_v17 = vpop.f32.mrb[8].mxu0 }
 0x5fb   :  { %v718_v19 = vpop.f32.mrb[9].mxu0 }
 0x5fc   :  { %1892 = vmatprep.mubr.msk.f32.mxu0 %vm348_vm3, %v718_v19  ;;  %v1582_v19 = vld [vmem:[#allocation2 + $0x118] sm:$0xff] }
 0x5fd   :  { %1893 = vmatmul.mubr.msk.f32.vlgmr.msra.gmra.mrb[0].mxu0 %vm348_vm3, %v1889_v17  ;;  %v1581_v17 = vld [vmem:[#allocation2 + $0x110] sm:$0xff] }
 0x5fe   :  { %1897 = vmatprep.mubr.msk.f32.mxu0 %vm348_vm3, %v2222_v32  ;;  %1896 = vmatpush3.msra.mxu0 %v537_v10 }
 0x5ff   :  { %1910 = vmatprep.subr.mxu0 %v1079_v20 }
 0x605   :  { %1898 = vmatmul.mubr.msk.f32.vlgmr.msra.gmra.mrb[0].mxu0 %vm348_vm3, %v2220_v31 }
 0x606   :  { %1912 = vmatprep.mubr.msk.f32.mxu0 %vm348_vm3, %v2230_v40  ;;  %1911 = vmatpush3.msra.mxu0 %v1079_v20  ;;  %v1986_v20 = vpack.c.bf16 %v1582_v19, %v1581_v17 }
 0x607   :  { %1925 = vmatprep.subr.mxu0 %v1352_v18 }
 0x60d   :  { %1913 = vmatmul.mubr.msk.f32.vlgmr.msra.gmra.mrb[0].mxu0 %vm348_vm3, %v2228_v39 }
 0x60e   :  { %1926 = vmatpush3.msra.mxu0 %v1352_v18  ;;  %v1490_v18 = vsub.s32 4, %v2256_v24 }
 0x60f   :  { %1975 = vmatprep.subr.bf16.mxu0 %v1974_v57 }
 0x662   :  { %v1924_v21 = vpop.f32.mrb[16].mxu1 }
 0x663   :  { %v1343_v22 = vpop.f32.mrb[17].mxu1 }
 0x664   :  { %1927 = vmatprep.mubr.msk.f32.mxu0 %vm348_vm3, %v1343_v22 }
 0x665   :  { %1928 = vmatmul.mubr.msk.f32.vlgmr.msra.gmra.mrb[0].mxu0 %vm348_vm3, %v1924_v21  ;;  %v1491_v21 = vrot.slane %v2259_v26, %v1490_v18 }
 0x666   :  { %1977 = vmatpush3.bf16.msra.mxu0 %v1974_v57  ;;  %v1705_v57 = vsub.s32 7, %v2256_v24 }
 0x667   :  { %1979 = vmatprep.subr.bf16.mxu0 %v1978_v59 }
 0x66a   :  { %1981 = vmatpush3.bf16.msra.mxu0 %v1978_v59 }
 0x66b   :  { %1983 = vmatprep.subr.bf16.mxu0 %v1982_v62 }
 0x66e   :  { %1985 = vmatpush3.bf16.msra.mxu0 %v1982_v62  ;;  %v1706_v62 = vrot.slane %v2259_v26, %v1705_v57 }
 0x66f   :  { %1987 = vmatprep.subr.bf16.mxu0 %v1986_v20 }
 0x672   :  { %1989 = vmatpush3.bf16.msra.mxu0 %v1986_v20 }
 0x738   :  { %v1929_v30 = vpop.f32.mrb[0].mxu0 }
 0x739   :  { %v1990_v31 = vadd.f32 %v1929_v30, %v267_v28  ;;  %v1425_v32 = vpop.f32.mrb[1].mxu0  ;;  %v1585_v30 = vsub.s32 5, %v2256_v24 }
 0x73a   :  { %v1992_v33 = vadd.f32 %v1425_v32, %v267_v28 }
 0x73b   :  { %v1991_v34 = vadd.f32 %v1990_v31, %v1439_v29  ;;  %v1586_v31 = vrot.slane %v2259_v26, %v1585_v30 }
 0x73c   :  { %v1993_v35 = vadd.f32 %v1992_v33, %v1439_v29 }
 0x73d   :  { %v1448_v36 = vsel %vm1444_vm5, %v1991_v34, 0.0 }
 0x73e   :  { %1449 = vadd.xlane.f32.xlu0 %v1448_v36  ;;  %v1445_v37 = vsel %vm1444_vm5, %v1993_v35, 0.0 }
 0x73f   :  { %1446 = vadd.xlane.f32.xlu1 %v1445_v37 }
 0x7cb   :  { %v1450_v38 = vpop.xlane.xlu0 %1449 }
 0x7cc   :  { %v1453_v39 = vmul.f32 0.03125, %v1450_v38  ;;  %v1447_v40 = vpop.xlane.xlu1 %1446 }
 0x7cd   :  { %v1452_v42 = vmul.f32 0.03125, %v1447_v40 }
 0x7ce   :  { %v1455_v44 = vsub.f32 %v1991_v34, %v1453_v39 }
 0x7cf   :  { %v1454_v45 = vsub.f32 %v1993_v35, %v1452_v42 }
 0x7d0   :  { %v1457_v46 = vmul.f32 %v1455_v44, %v1455_v44 }
 0x7d1   :  { %v1456_v47 = vmul.f32 %v1454_v45, %v1454_v45 }
 0x7d2   :  { %v1461_v48 = vsel %vm1444_vm5, %v1457_v46, 0.0 }
 0x7d3   :  { %1462 = vadd.xlane.f32.xlu0 %v1461_v48  ;;  %v1458_v49 = vsel %vm1444_vm5, %v1456_v47, 0.0 }
 0x7d4   :  { %1459 = vadd.xlane.f32.xlu1 %v1458_v49 }
 0x860   :  { %v1463_v63 = vpop.xlane.xlu0 %1462 }
 0x861   :  { %v1465_v0 = vmul.f32 0.03125, %v1463_v63  ;;  %v1460_v1 = vpop.xlane.xlu1 %1459 }
 0x862   :  { %v1464_v2 = vmul.f32 0.03125, %v1460_v1 }
 0x863   :  { %v1467_v3 = vadd.f32 1e-05, %v1465_v0 }
 0x864   :  { %v1466_v4 = vadd.f32 1e-05, %v1464_v2 }
 0x865   :  { %2041 = vrsqrt.f32 %v1467_v3 }
 0x866   :  { %2043 = vrsqrt.f32 %v1466_v4 }
 0x86f   :  { %v2042_v8 = vpop.eup %2041 }
 0x870   :  { %v2044_v9 = vpop.eup %2043  ;;  %v1471_v10 = vmul.f32 %v2042_v8, %v1455_v44 }
 0x871   :  { %v1470_v11 = vmul.f32 %v2044_v9, %v1454_v45 }
 0x872   :  { %v1477_v13 = vmul.f32 %v1475_v7, %v1471_v10 }
 0x873   :  { %v1476_v14 = vmul.f32 %v1475_v7, %v1470_v11 }
 0x874   :  { %v1483_v16 = vadd.f32 %v1481_v12, %v1477_v13 }
 0x875   :  { %v1482_v15 = vadd.f32 %v1481_v12, %v1476_v14 }
 0x877   :  { %1938 = vmatprep.mubr.msk.f32.mxu1 %vm1444_vm5, %v1482_v15 }
 0x878   :  { %1939 = vmatmul.mubr.msk.f32.vlgmr.msra.gmra.mrb[18].mxu1 %vm1444_vm5, %v1483_v16 }
 0x94b   :  { %v1940_v22 = vpop.f32.mrb[18].mxu1 }
 0x94c   :  { %v1570_v23 = vadd.f32 %v1940_v22, %v1491_v21  ;;  %v1564_v25 = vpop.f32.mrb[19].mxu1 }
 0x94d   :  { %v1565_v27 = vadd.f32 %v1564_v25, %v1491_v21 }
 0x94e   :  { %v1574_v29 = vmax.f32 %v1570_v23, 0.0 }
 0x94f   :  { %v1573_v28 = vmax.f32 %v1565_v27, 0.0 }
 0x951   :  { %1957 = vmatprep.mubr.msk.f32.mxu0 %vm1587_vm6, %v1573_v28 }
 0x952   :  { %1958 = vmatmul.mubr.msk.f32.vlgmr.msra.gmra.mrb[10].mxu0 %vm1587_vm6, %v1574_v29 }
 0xa25   :  { %v1959_v32 = vpop.f32.mrb[10].mxu0 }
 0xa26   :  { %v1666_v33 = vadd.f32 %v1959_v32, %v1586_v31  ;;  %v1660_v34 = vpop.f32.mrb[11].mxu0 }
 0xa27   :  { %v1661_v35 = vadd.f32 %v1660_v34, %v1586_v31 }
 0xa28   :  { %v1670_v36 = vadd.f32 %v1666_v33, %v1483_v16 }
 0xa29   :  { %v1669_v37 = vadd.f32 %v1661_v35, %v1482_v15 }
 0xa2a   :  { %v1674_v38 = vsel %vm1444_vm5, %v1670_v36, 0.0 }
 0xa2b   :  { %1675 = vadd.xlane.f32.xlu0 %v1674_v38  ;;  %v1671_v39 = vsel %vm1444_vm5, %v1669_v37, 0.0 }
 0xa2c   :  { %1672 = vadd.xlane.f32.xlu1 %v1671_v39 }
 0xab8   :  { %v1676_v40 = vpop.xlane.xlu0 %1675 }
 0xab9   :  { %v1678_v42 = vmul.f32 0.03125, %v1676_v40  ;;  %v1673_v44 = vpop.xlane.xlu1 %1672 }
 0xaba   :  { %v1677_v45 = vmul.f32 0.03125, %v1673_v44 }
 0xabb   :  { %v1680_v46 = vsub.f32 %v1670_v36, %v1678_v42 }
 0xabc   :  { %v1679_v47 = vsub.f32 %v1669_v37, %v1677_v45 }
 0xabd   :  { %v1682_v48 = vmul.f32 %v1680_v46, %v1680_v46 }
 0xabe   :  { %v1681_v49 = vmul.f32 %v1679_v47, %v1679_v47 }
 0xabf   :  { %v1686_v50 = vsel %vm1444_vm5, %v1682_v48, 0.0 }
 0xac0   :  { %1687 = vadd.xlane.f32.xlu0 %v1686_v50  ;;  %v1683_v51 = vsel %vm1444_vm5, %v1681_v49, 0.0 }
 0xac1   :  { %1684 = vadd.xlane.f32.xlu1 %v1683_v51 }
 0xb4d   :  { %v1688_v52 = vpop.xlane.xlu0 %1687 }
 0xb4e   :  { %v1690_v53 = vmul.f32 0.03125, %v1688_v52  ;;  %v1685_v54 = vpop.xlane.xlu1 %1684 }
 0xb4f   :  { %v1689_v55 = vmul.f32 0.03125, %v1685_v54 }
 0xb50   :  { %v1692_v56 = vadd.f32 1e-05, %v1690_v53 }
 0xb51   :  { %v1691_v41 = vadd.f32 1e-05, %v1689_v55 }
 0xb52   :  { %2045 = vrsqrt.f32 %v1692_v56 }
 0xb53   :  { %2047 = vrsqrt.f32 %v1691_v41 }
 0xb5c   :  { %v2046_v59 = vpop.eup %2045 }
 0xb5d   :  { %v2048_v60 = vpop.eup %2047  ;;  %v1696_v61 = vmul.f32 %v2046_v59, %v1680_v46 }
 0xb5e   :  { %v1695_v63 = vmul.f32 %v2048_v60, %v1679_v47 }
 0xb5f   :  { %v1702_v0 = vmul.f32 %v1700_v58, %v1696_v61 }
 0xb60   :  { %v1701_v1 = vmul.f32 %v1700_v58, %v1695_v63 }
 0xb61   :  { %v1708_v2 = vadd.f32 %v1706_v62, %v1702_v0 }
 0xb62   :  { %v1707_v3 = vadd.f32 %v1706_v62, %v1701_v1 }
 0xb63   :  { %1710 = vst.msk [vmem:[#allocation5 + $0x8] sm:$0xff] %vm1444_vm5, %v1708_v2 }
 0xb64   :  { %1709 = vst.msk [vmem:[#allocation5] sm:$0xff] %vm1444_vm5, %v1707_v3 }
 0xb65   :  { %2082 = shalt.err (!%p2079_p12)
}
 0xb66   :  { %s2083_s5 = scalar_lea.hbm %s2305_s2, 256 }
 0xb67   :  { %p2084_p13 = scmp.ne.s32.totalorder %s2305_s2, %s2083_s5  ;;  %p2087_p0 = scmp.lt.u32.totalorder %s2083_s5, %s2305_s2 }
 0xb69   :  { %p2089_p1 = pnand %p2087_p0, %p2084_p13 }
 0xb6b   :  { %2092 = shalt.err (!%p2089_p1)
}
 0xb6c   :  { %1722 = dma.vmem_to_hbm [thread:$0]  %s1717_s29, 256, %s2305_s2, [#allocation4], %s2098_s19, %s2098_s19, %s2099_s20  }
 0xb6d   :  { %2095 = dma.done.wait [#allocation4], 256  }
 0xb6e   :  { %2096 = vsyncadd [#allocation4], 4294967040 }
 0xb6f   :  { %1726 = vsyncpa [#allocation3], 1 }
 0xb70   :  { %1727 = vsyncpa [#allocation4], 1 }

</bundles_post_ra>
